<compile_context>
chip_gen: v6e
topology: v6e:2x2x1
jax: 0.10.0
libtpu: 0.0.40
codegen_flags: <defaults>
</compile_context>

<pallas_src>
import math

import jax
import jax.numpy as jnp
import numpy as np
from jax.experimental import pallas as pl
from jax.experimental.pallas import tpu as pltpu


def _round_up(n, m):
    return -(-n // m) * m


def _vmem_capacity_bytes(default=64 * 2 ** 20):
    """Physical VMEM of the current part; conservative 64 MiB fallback (v7x)."""
    try:
        cap = getattr(pltpu.get_tpu_info(), "vmem_capacity_bytes", None)
        if cap:
            return int(cap)
    except Exception:
        pass
    return default


def _make_kernel(K, C, Wp, dilation, L, R, row_axis):
    """Stacked-tap (fused im2col) conv kernel.

    x_ref  : (C, F)            resident padded image, compute dtype, flat rows
    w_ref  : (out_dim, K*K*C)  stacked conv weights, compute dtype
    b_ref  : (out_dim, 1)      bias, f32
    o_ref  : (out_dim, L)      output tile, f32 (lane dim = flattened pixels)
    col_ref: (K*K*C, L)        VMEM scratch holding the stacked shifted slices
    """

    def kernel(x_ref, w_ref, b_ref, o_ref, col_ref):
        if R > 1:
            base = pl.multiple_of(pl.program_id(row_axis) * L, 128)
        else:
            base = 0  # fully static slicing when there is a single row tile

        # Build the (K*K*C, L) stacked operand: tap (kh, kw) is the contiguous
        # row-flattened slice shifted by (kh*Wp + kw)*dilation.
        for kh in range(K):
            for kw in range(K):
                t = kh * K + kw
                off = (kh * Wp + kw) * dilation
                col_ref[pl.ds(t * C, C), :] = x_ref[:, pl.ds(base + off, L)]

        # One deep MXU contraction replaces K*K shallow dots + (K*K-1) VPU adds.
        acc = jnp.dot(w_ref[...], col_ref[...],
                      preferred_element_type=jnp.float32)
        o_ref[...] = (acc + b_ref[...]).astype(o_ref.dtype)

    return kernel


def reflective_conv_layer(x, weight, bias, *, kernel_size, stride=1, dilation=1,
                          compute_dtype=jnp.bfloat16, target_lanes=16384):
    """x: (N, C, H, W) f32, weight: (out_dim, C, K, K), bias: (out_dim,)."""
    N, C, H, W = x.shape
    out_dim = weight.shape[0]
    K = int(kernel_size)
    d = int(dilation)
    s = int(stride)
    pad = d * (K - 1) // 2
    if pad >= H or pad >= W:
        raise ValueError("reflection padding must be smaller than the spatial size")

    cdt = jnp.dtype(compute_dtype)
    esz = cdt.itemsize
    spack = 8 * (4 // esz)            # sublane packing (8 for f32, 16 for bf16)

    # ReflectionPad2d in the compute dtype (halves pad/DMA traffic for bf16).
    xp = jnp.pad(x.astype(cdt), ((0, 0), (0, 0), (pad, pad), (pad, pad)),
                 mode="reflect")
    Hp, Wp = H + 2 * pad, W + 2 * pad
    OH1 = Hp - d * (K - 1)            # stride-1 valid output rows per image
    OW1 = Wp - d * (K - 1)            # stride-1 valid output cols per image
    KKC = K * K * C
    halo = d * (K - 1) + 1            # extra flat rows so shifted slices stay in bounds
    step = 128 // math.gcd(Wp, 128)   # row-tile granule keeping L % 128 == 0

    # Stacked weights: w_flat[o, (kh*K + kw)*C + c] = weight[o, c, kh, kw].
    w_flat = jnp.transpose(weight, (0, 2, 3, 1)).reshape(out_dim, KKC).astype(cdt)
    b2 = bias.reshape(out_dim, 1).astype(jnp.float32)

    # ------------------------ VMEM-aware tiling plan -------------------------
    vmem_cap = _vmem_capacity_bytes()
    vmem_budget = int(vmem_cap * 0.85)
    vmem_limit = int(vmem_cap * 0.90)
    img_per_row = _round_up(C, spack) * Wp * esz               # image bytes / flat row
    lane_bytes = (_round_up(KKC, spack) * esz                  # im2col scratch
                  + _round_up(out_dim, 8) * 4 * 3)             # f32 out block x2 + acc
    fixed = 2 * _round_up(out_dim, spack) * _round_up(KKC, 128) * esz + 2 * 2 ** 20

    def _plan(total_rows):
        """Return (TOH, R, img_bufs) or None if the resident image cannot fit."""
        desired = max(1, target_lanes // Wp)
        for bufs in (2, 1):           # bufs=1 -> pl.Buffered(1) on the image spec
            num = vmem_budget - bufs * img_per_row * (total_rows + halo) - fixed
            den = bufs * img_per_row + lane_bytes * Wp
            tmax = num // den
            if tmax < 1:
                continue
            if tmax >= total_rows and desired >= total_rows:
                return total_rows, 1, bufs        # whole row range in one tile
            toh = (min(desired, tmax) // step) * step
            if toh >= step:
                toh = min(toh, total_rows)
                if toh >= total_rows:
                    return total_rows, 1, bufs
                return toh, -(-total_rows // toh), bufs
            if tmax >= total_rows:
                return total_rows, 1, bufs
            if tmax >= step:
                return step, -(-total_rows // step), bufs
        return None

    # Joint layout: fold all batch images into one flat stream when a single
    # image is too small to fill a lane-dense tile on its own.
    use_joint = (N > 1) and (OH1 * Wp < target_lanes)
    plan_j = _plan(N * Hp) if use_joint else None

    if plan_j is not None:
        TOH, R, img_bufs = plan_j
        rows_pad = R * TOH
        Rin = rows_pad + halo
        L = TOH * Wp
        xj = jnp.transpose(xp, (1, 0, 2, 3)).reshape(C, N * Hp, Wp)
        xj = jnp.pad(xj, ((0, 0), (0, Rin - N * Hp), (0, 0)))
        x_flat = xj.reshape(C, Rin * Wp)

        img_kwargs = {"pipeline_mode": pl.Buffered(1)} if img_bufs == 1 else {}
        out = pl.pallas_call(
            _make_kernel(K, C, Wp, d, L, R, row_axis=0),
            out_shape=jax.ShapeDtypeStruct((out_dim, rows_pad * Wp), jnp.float32),
            grid_spec=pltpu.PrefetchScalarGridSpec(
                num_scalar_prefetch=0,
                grid=(R,),
                in_specs=[
                    pl.BlockSpec((C, Rin * Wp), lambda r: (0, 0), **img_kwargs),
                    pl.BlockSpec((out_dim, KKC), lambda r: (0, 0)),
                    pl.BlockSpec((out_dim, 1), lambda r: (0, 0)),
                ],
                out_specs=pl.BlockSpec((out_dim, L), lambda r: (0, r)),
                scratch_shapes=[pltpu.VMEM((KKC, L), cdt)],
            ),
            compiler_params=pltpu.CompilerParams(
                dimension_semantics=("parallel",),
                vmem_limit_bytes=vmem_limit),
        )(x_flat, w_flat, b2)

        y = out.reshape(out_dim, rows_pad, Wp)[:, :N * Hp, :]
        y = y.reshape(out_dim, N, Hp, Wp).transpose(1, 0, 2, 3)
        return y[:, :, :OH1:s, :OW1:s].astype(x.dtype)

    # Per-batch resident layout: grid (N, R); each core keeps one image resident.
    plan_b = _plan(OH1)
    if plan_b is None:
        # TODO(synk): halo-streamed row tiles via manual make_async_copy for
        # images whose padded plane does not fit in VMEM (large H*W*C on v7x).
        raise ValueError("padded image too large for the VMEM-resident scheme")
    TOH, R, img_bufs = plan_b
    rows_pad = R * TOH
    Rin = rows_pad + halo
    L = TOH * Wp
    xb = jnp.pad(xp, ((0, 0), (0, 0), (0, Rin - Hp), (0, 0)))
    x_flat = xb.reshape(N, C, Rin * Wp)

    img_kwargs = {"pipeline_mode": pl.Buffered(1)} if img_bufs == 1 else {}
    out = pl.pallas_call(
        _make_kernel(K, C, Wp, d, L, R, row_axis=1),
        out_shape=jax.ShapeDtypeStruct((N, out_dim, rows_pad * Wp), jnp.float32),
        grid_spec=pltpu.PrefetchScalarGridSpec(
            num_scalar_prefetch=0,
            grid=(N, R),
            in_specs=[
                pl.BlockSpec((None, C, Rin * Wp), lambda n, r: (n, 0, 0),
                             **img_kwargs),
                pl.BlockSpec((out_dim, KKC), lambda n, r: (0, 0)),
                pl.BlockSpec((out_dim, 1), lambda n, r: (0, 0)),
            ],
            out_specs=pl.BlockSpec((None, out_dim, L), lambda n, r: (n, 0, r)),
            scratch_shapes=[pltpu.VMEM((KKC, L), cdt)],
        ),
        compiler_params=pltpu.CompilerParams(
            # batch across cores; row tiles reuse the resident image per core
            dimension_semantics=("parallel", "arbitrary"),
            vmem_limit_bytes=vmem_limit),
    )(x_flat, w_flat, b2)

    y = out.reshape(N, out_dim, rows_pad, Wp)
    return y[:, :, :OH1:s, :OW1:s].astype(x.dtype)


# -----------------------------------------------------------------------------
# Demo / self-check
# -----------------------------------------------------------------------------
if __name__ == "__main__":
    in_dim, out_dim, kernel_size, stride, dilation = 4, 8, 3, 1, 1
    N, H, W = 2, 16, 16

    key = jax.random.PRNGKey(0)
    kx, kw, kb = jax.random.split(key, 3)
    x = jax.random.normal(kx, (N, in_dim, H, W), dtype=jnp.float32)
    fan_in = in_dim * kernel_size * kernel_size
    bound = 1.0 / np.sqrt(fan_in)
    weight = jax.random.uniform(kw, (out_dim, in_dim, kernel_size, kernel_size),
                                minval=-bound, maxval=bound, dtype=jnp.float32)
    bias = jax.random.uniform(kb, (out_dim,), minval=-bound, maxval=bound,
                              dtype=jnp.float32)

    fwd = jax.jit(lambda x: reflective_conv_layer(
        x, weight, bias, kernel_size=kernel_size, stride=stride,
        dilation=dilation))
    out = jax.block_until_ready(fwd(x))

    # Reference: reflection pad + VALID conv via XLA on the SAME bf16 inputs
    # with f32 accumulation -> tight tolerance (only summation-order noise).
    pad = dilation * (kernel_size - 1) // 2
    xp_ref = jnp.pad(x.astype(jnp.bfloat16),
                     ((0, 0), (0, 0), (pad, pad), (pad, pad)), mode="reflect")
    ref = jax.lax.conv_general_dilated(
        xp_ref, weight.astype(jnp.bfloat16),
        window_strides=(stride, stride), padding="VALID",
        rhs_dilation=(dilation, dilation),
        dimension_numbers=("NCHW", "OIHW", "NCHW"),
        preferred_element_type=jnp.float32) + bias.reshape(1, -1, 1, 1)

    assert out.shape == (N, out_dim, H, W), out.shape
    err = float(np.max(np.abs(np.asarray(out) - np.asarray(ref))))
    assert np.allclose(np.asarray(out), np.asarray(ref), atol=1e-4, rtol=1e-4), err
    print("KERNEL_OK")
</pallas_src>

<mosaic_0001>
module attributes {stable_mosaic.version = 11 : i64} {
  func.func @kernel(%arg0: i32, %arg1: memref<4x702xbf16, #tpu.memory_space<vmem>>, %arg2: memref<8x36xbf16, #tpu.memory_space<vmem>>, %arg3: memref<8x1xf32, #tpu.memory_space<vmem>>, %arg4: memref<8x648xf32, #tpu.memory_space<vmem>>, %arg5: memref<36x648xbf16, #tpu.memory_space<vmem>>) attributes {dimension_semantics = [#tpu.dimension_semantics<parallel>], iteration_bounds = array<i64: 1>, scalar_prefetch = 0 : i64, scratch_operands = 1 : i64, tpu.core_type = #tpu.core_type<tc>, window_params = [{pipeline_mode = #tpu.pipeline_mode<synchronous>, transform_indices = @transform_0, window_bounds = array<i64: 4, 702>}, {pipeline_mode = #tpu.pipeline_mode<synchronous>, transform_indices = @transform_1, window_bounds = array<i64: 8, 36>}, {pipeline_mode = #tpu.pipeline_mode<synchronous>, transform_indices = @transform_2, window_bounds = array<i64: 8, 1>}, {transform_indices = @transform_3, window_bounds = array<i64: 8, 648>}]} {
    %c0 = arith.constant 0 : index
    %c0_0 = arith.constant 0 : index
    %0 = vector.load %arg1[%c0, %c0_0] : memref<4x702xbf16, #tpu.memory_space<vmem>>, vector<4x648xbf16>
    %c0_1 = arith.constant 0 : index
    %c0_2 = arith.constant 0 : index
    %1 = vector.load %arg5[%c0_1, %c0_2] : memref<36x648xbf16, #tpu.memory_space<vmem>>, vector<4x648xbf16>
    tpu.vector_store %arg5[%c0_1, %c0_2], %0 {strides = array<i32>} : memref<36x648xbf16, #tpu.memory_space<vmem>>, vector<4x648xbf16>,
    %c0_3 = arith.constant 0 : index
    %c1 = arith.constant 1 : index
    %2 = vector.load %arg1[%c0_3, %c1] : memref<4x702xbf16, #tpu.memory_space<vmem>>, vector<4x648xbf16>
    %c4 = arith.constant 4 : index
    %c0_4 = arith.constant 0 : index
    %3 = vector.load %arg5[%c4, %c0_4] : memref<36x648xbf16, #tpu.memory_space<vmem>>, vector<4x648xbf16>
    tpu.vector_store %arg5[%c4, %c0_4], %2 {strides = array<i32>} : memref<36x648xbf16, #tpu.memory_space<vmem>>, vector<4x648xbf16>,
    %c0_5 = arith.constant 0 : index
    %c2 = arith.constant 2 : index
    %4 = vector.load %arg1[%c0_5, %c2] : memref<4x702xbf16, #tpu.memory_space<vmem>>, vector<4x648xbf16>
    %c8 = arith.constant 8 : index
    %c0_6 = arith.constant 0 : index
    %5 = vector.load %arg5[%c8, %c0_6] : memref<36x648xbf16, #tpu.memory_space<vmem>>, vector<4x648xbf16>
    tpu.vector_store %arg5[%c8, %c0_6], %4 {strides = array<i32>} : memref<36x648xbf16, #tpu.memory_space<vmem>>, vector<4x648xbf16>,
    %c0_7 = arith.constant 0 : index
    %c18 = arith.constant 18 : index
    %6 = vector.load %arg1[%c0_7, %c18] : memref<4x702xbf16, #tpu.memory_space<vmem>>, vector<4x648xbf16>
    %c12 = arith.constant 12 : index
    %c0_8 = arith.constant 0 : index
    %7 = vector.load %arg5[%c12, %c0_8] : memref<36x648xbf16, #tpu.memory_space<vmem>>, vector<4x648xbf16>
    tpu.vector_store %arg5[%c12, %c0_8], %6 {strides = array<i32>} : memref<36x648xbf16, #tpu.memory_space<vmem>>, vector<4x648xbf16>,
    %c0_9 = arith.constant 0 : index
    %c19 = arith.constant 19 : index
    %8 = vector.load %arg1[%c0_9, %c19] : memref<4x702xbf16, #tpu.memory_space<vmem>>, vector<4x648xbf16>
    %c16 = arith.constant 16 : index
    %c0_10 = arith.constant 0 : index
    %9 = vector.load %arg5[%c16, %c0_10] : memref<36x648xbf16, #tpu.memory_space<vmem>>, vector<4x648xbf16>
    tpu.vector_store %arg5[%c16, %c0_10], %8 {strides = array<i32>} : memref<36x648xbf16, #tpu.memory_space<vmem>>, vector<4x648xbf16>,
    %c0_11 = arith.constant 0 : index
    %c20 = arith.constant 20 : index
    %10 = vector.load %arg1[%c0_11, %c20] : memref<4x702xbf16, #tpu.memory_space<vmem>>, vector<4x648xbf16>
    %c20_12 = arith.constant 20 : index
    %c0_13 = arith.constant 0 : index
    %11 = vector.load %arg5[%c20_12, %c0_13] : memref<36x648xbf16, #tpu.memory_space<vmem>>, vector<4x648xbf16>
    tpu.vector_store %arg5[%c20_12, %c0_13], %10 {strides = array<i32>} : memref<36x648xbf16, #tpu.memory_space<vmem>>, vector<4x648xbf16>,
    %c0_14 = arith.constant 0 : index
    %c36 = arith.constant 36 : index
    %12 = vector.load %arg1[%c0_14, %c36] : memref<4x702xbf16, #tpu.memory_space<vmem>>, vector<4x648xbf16>
    %c24 = arith.constant 24 : index
    %c0_15 = arith.constant 0 : index
    %13 = vector.load %arg5[%c24, %c0_15] : memref<36x648xbf16, #tpu.memory_space<vmem>>, vector<4x648xbf16>
    tpu.vector_store %arg5[%c24, %c0_15], %12 {strides = array<i32>} : memref<36x648xbf16, #tpu.memory_space<vmem>>, vector<4x648xbf16>,
    %c0_16 = arith.constant 0 : index
    %c37 = arith.constant 37 : index
    %14 = vector.load %arg1[%c0_16, %c37] : memref<4x702xbf16, #tpu.memory_space<vmem>>, vector<4x648xbf16>
    %c28 = arith.constant 28 : index
    %c0_17 = arith.constant 0 : index
    %15 = vector.load %arg5[%c28, %c0_17] : memref<36x648xbf16, #tpu.memory_space<vmem>>, vector<4x648xbf16>
    tpu.vector_store %arg5[%c28, %c0_17], %14 {strides = array<i32>} : memref<36x648xbf16, #tpu.memory_space<vmem>>, vector<4x648xbf16>,
    %c0_18 = arith.constant 0 : index
    %c38 = arith.constant 38 : index
    %16 = vector.load %arg1[%c0_18, %c38] : memref<4x702xbf16, #tpu.memory_space<vmem>>, vector<4x648xbf16>
    %c32 = arith.constant 32 : index
    %c0_19 = arith.constant 0 : index
    %17 = vector.load %arg5[%c32, %c0_19] : memref<36x648xbf16, #tpu.memory_space<vmem>>, vector<4x648xbf16>
    tpu.vector_store %arg5[%c32, %c0_19], %16 {strides = array<i32>} : memref<36x648xbf16, #tpu.memory_space<vmem>>, vector<4x648xbf16>,
    %c0_20 = arith.constant 0 : index
    %c0_21 = arith.constant 0 : index
    %18 = vector.load %arg2[%c0_20, %c0_21] : memref<8x36xbf16, #tpu.memory_space<vmem>>, vector<8x36xbf16>
    %c0_22 = arith.constant 0 : index
    %c0_23 = arith.constant 0 : index
    %19 = vector.load %arg5[%c0_22, %c0_23] : memref<36x648xbf16, #tpu.memory_space<vmem>>, vector<36x648xbf16>
    %cst = arith.constant dense<0.000000e+00> : vector<8x648xf32>
    %20 = tpu.matmul %18, %19, %cst {dimension_numbers = #tpu.dot_dimension_numbers<[1], [0], [0], [1], [0, 0, 1, 1], [], []>} : vector<8x36xbf16>, vector<36x648xbf16>, vector<8x648xf32> -> vector<8x648xf32>
    %c0_24 = arith.constant 0 : index
    %c0_25 = arith.constant 0 : index
    %21 = vector.load %arg3[%c0_24, %c0_25] : memref<8x1xf32, #tpu.memory_space<vmem>>, vector<8x1xf32>
    %22 = vector.broadcast %21 : vector<8x1xf32> to vector<8x648xf32>
    %23 = arith.addf %20, %22 : vector<8x648xf32>
    %c0_26 = arith.constant 0 : index
    %c0_27 = arith.constant 0 : index
    %24 = vector.load %arg4[%c0_26, %c0_27] : memref<8x648xf32, #tpu.memory_space<vmem>>, vector<8x648xf32>
    tpu.vector_store %arg4[%c0_26, %c0_27], %23 {strides = array<i32>} : memref<8x648xf32, #tpu.memory_space<vmem>>, vector<8x648xf32>,
    return
  }
  func.func @transform_0(%arg0: i32) -> (i32, i32) {
    %c0_i32 = arith.constant 0 : i32
    %c0_i32_0 = arith.constant 0 : i32
    %c0_i32_1 = arith.constant 0 : i32
    return %c0_i32, %c0_i32_0 : i32, i32
  }
  func.func @transform_1(%arg0: i32) -> (i32, i32) {
    %c0_i32 = arith.constant 0 : i32
    %c0_i32_0 = arith.constant 0 : i32
    %c0_i32_1 = arith.constant 0 : i32
    return %c0_i32, %c0_i32_0 : i32, i32
  }
  func.func @transform_2(%arg0: i32) -> (i32, i32) {
    %c0_i32 = arith.constant 0 : i32
    %c0_i32_0 = arith.constant 0 : i32
    %c0_i32_1 = arith.constant 0 : i32
    return %c0_i32, %c0_i32_0 : i32, i32
  }
  func.func @transform_3(%arg0: i32) -> (i32, i32) {
    %c0_i32 = arith.constant 0 : i32
    %c0_i32_0 = arith.constant 0 : i32
    return %c0_i32, %arg0 : i32, i32
  }
}

</mosaic_0001>

<bundles_post_ra>
// kernel: _lambda_.1
= control target key start
LH: loop header
LB: loop body
LE: loop exit
PB: predicated region body
PF: predicated region fallthrough
CT: control target
= control target key end

     0   :  { %v58_v0 = vlaneseq  ;;  %v758_v1 = vmov 1983009808   ;;  %s759_s14 = smov 90   ;;  %s760_s15 = smov 109   ;;  %vm46_vm0 = vcmask 1041408   ;;  %vm47_vm1 = vcmask 62468   ;;  %s987_s0 = inlined_call_operand.vmem [shape: bf16[4,702], index: 0, kind: input, shape index: {}]   ;;  %s988_s2 = inlined_call_operand.vmem [shape: f32[8,1], index: 2, kind: input, shape index: {}]   ;;  %s989_s1 = inlined_call_operand.vmem [shape: bf16[8,36], index: 1, kind: input, shape index: {}]   ;;  %s990_s3 = inlined_call_operand.vmem [shape: f32[8,648], index: 3, kind: output, shape index: {}]  }
   0x1   :  { %v56_v2 = vunpack.c.l.s4 %v758_v1  ;;  %v387_v3 = vld [vmem:[%s987_s0] sm:$0xff]  ;;  %s761_s16 = smov 108   ;;  %s762_s17 = smov 92   ;;  %vm803_vm2 = vmor %vm47_vm1, %vm46_vm0  ;;  %v731_v14 = vld [vmem:[%s987_s0 + $0x8] ss:$0 sps:$4 sm:$0xff]   ;;  %v767_v15 = vmov 0  }
   0x2   :  { %v59_v4 = vshrl.u32 %v58_v0, 7  ;;  %v391_v5 = vcombine.high %v387_v3, %v387_v3  ;;  %688 = vst.sshfl [vmem:[#allocation2] sm:$0xf pattern:$0x76325410] %v387_v3  ;;  %v248_v10 = vcombine.low %v387_v3, %v387_v3  ;;  %s763_s18 = smov 91   ;;  %585 = vmatprep.mubr.bf16.mxu0 %v767_v15  ;;  %626 = vmatprep.mubr.bf16.mxu1 %v767_v15 }
   0x3   :  { %v57_v6 = vunpack.c.0.s8 %v56_v2  ;;  %s764_s19 = smov 127   ;;  %v691_v12 = vld.sshfl [vmem:[%s987_s0 + $0x8] sm:$0x33 pattern:$0x76325410]  ;;  %s765_s22 = smov 126   ;;  %728 = vset.pattern.permute.xlu0 %v767_v15 }
   0x4   :  { %689 = vst.sshfl [vmem:[#allocation2 + $0x8] sm:$0xf pattern:$0x76325410] %v391_v5  ;;  %49 = vst.msk [vmem:[#allocation2 + $0x10] sm:$0x33] %vm803_vm2, %v691_v12 }
   0x5   :  { %v60_v7 = vsub.s32 %v57_v6, %v59_v4  ;;  %s766_s23 = smov 110   ;;  %v732_v17 = vld [vmem:[%s987_s0 + $0x8] ss:$0 sps:$4 sm:$0xff]   ;;  %v450_v23 = vld [vmem:[%s988_s2] sm:$0xff]  ;;  %vm86_vm3 = vcmask 1043456   ;;  %vm423_vm4 = vcmask 736256  }
   0x6   :  { %v733_v18 = vld [vmem:[%s987_s0 + $0x8] ss:$0 sps:$4 sm:$0xff]   ;;  %vm233_vm5 = vcmask 891904   ;;  %vm281_vm6 = vcmask 883712   ;;  %vm328_vm7 = vcmask 752640   ;;  %vm376_vm8 = vcmask 744448  }
   0x7   :  { %v398_v8 = vrot.slane %v387_v3, %v60_v7  ;;  %v405_v9 = vrot.slane %v391_v5, %v60_v7  ;;  %v255_v11 = vrot.slane %v248_v10, %v60_v7  ;;  %v270_v16 = vrot.slane %v731_v14, %v60_v7  ;;  %v734_v21 = vld [vmem:[%s987_s0 + $0x8] ss:$0 sps:$4 sm:$0xff]  }
   0x8   :  { %v76_v19 = vrot.slane %v732_v17, %v60_v7  ;;  %v365_v20 = vrot.slane %v733_v18, %v60_v7  ;;  %v175_v22 = vrot.slane %v734_v21, %v60_v7  ;;  %vm88_vm9 = vcmask 1039360  }
   0x9   :  { %413 = vrot.lane.b32.xlu0 %v398_v8, %s759_s14  ;;  %223 = vrot.lane.b32.xlu1 %v398_v8, %s760_s15  ;;  %vm138_vm10 = vcmask 1031168   ;;  %vm186_vm11 = vcmask 900096   ;;  %vm98_vm12 = vcmask 1043458   ;;  %vm99_vm13 = vcmask 64518  }
   0xa   :  { %vm906_vm14 = vmor %vm99_vm13, %vm98_vm12  ;;  %vm531_vm15 = vcmask 293888  }
   0xd   :  { %415 = vrot.lane.b32.xlu0 %v405_v9, %s759_s14  ;;  %225 = vrot.lane.b32.xlu1 %v405_v9, %s760_s15 }
  0x11   :  { %271 = vrot.lane.b32.xlu0 %v255_v11, %s761_s16  ;;  %273 = vrot.lane.b32.xlu1 %v398_v8, %s761_s16 }
  0x15   :  { %318 = vrot.lane.b32.xlu0 %v398_v8, %s762_s17  ;;  %320 = vrot.lane.b32.xlu1 %v405_v9, %s762_s17 }
  0x19   :  { %366 = vrot.lane.b32.xlu0 %v255_v11, %s763_s18  ;;  %368 = vrot.lane.b32.xlu1 %v398_v8, %s763_s18 }
  0x1d   :  { %79 = vrot.lane.b32.xlu1 %v398_v8, %s764_s19  ;;  %77 = vrot.lane.b32.xlu0 %v255_v11, %s764_s19 }
  0x21   :  { %130 = vrot.lane.b32.xlu1 %v405_v9, %s765_s22  ;;  %128 = vrot.lane.b32.xlu0 %v398_v8, %s765_s22 }
  0x25   :  { %178 = vrot.lane.b32.xlu1 %v398_v8, %s766_s23  ;;  %176 = vrot.lane.b32.xlu0 %v255_v11, %s766_s23 }
  0x29   :  { %227 = vrot.lane.b32.xlu1 %v691_v12, %s760_s15  ;;  %417 = vrot.lane.b32.xlu0 %v691_v12, %s759_s14 }
  0x2d   :  { %322 = vrot.lane.b32.xlu1 %v691_v12, %s762_s17  ;;  %275 = vrot.lane.b32.xlu0 %v270_v16, %s761_s16 }
  0x31   :  { %81 = vrot.lane.b32.xlu1 %v76_v19, %s764_s19  ;;  %370 = vrot.lane.b32.xlu0 %v365_v20, %s763_s18 }
  0x35   :  { %180 = vrot.lane.b32.xlu1 %v175_v22, %s766_s23  ;;  %132 = vrot.lane.b32.xlu0 %v691_v12, %s765_s22 }
  0x39   :  { %453 = vperm.xlu0 %728, %v450_v23  }
  0x7b   :  { %v414_v24 = vpop.permute.xlu0 %413  ;;  %v224_v25 = vpop.permute.xlu1 %223 }
  0x7c   :  { %v419_v28 = vrot.slane %v414_v24, 4  ;;  %v229_v29 = vrot.slane %v224_v25, 4 }
  0x7f   :  { %v831_v26 = vpop.permute.xlu0 %415  ;;  %v833_v27 = vpop.permute.xlu1 %225 }
  0x80   :  { %v420_v30 = vrot.slane %v831_v26, 4  ;;  %v230_v31 = vrot.slane %v833_v27, 4 }
  0x82   :  { %v422_v32 = vsel %vm86_vm3, %v419_v28, %v420_v30  ;;  %v232_v33 = vsel %vm86_vm3, %v229_v29, %v230_v31 }
  0x83   :  { %v424_v34 = vsel %vm423_vm4, %v414_v24, %v422_v32  ;;  %v234_v35 = vsel %vm233_vm5, %v224_v25, %v232_v33  ;;  %v272_v36 = vpop.permute.xlu0 %271  ;;  %v845_v37 = vpop.permute.xlu1 %273 }
  0x84   :  { %431 = vst [vmem:[#allocation2 + $0x60] sm:$0x33] %v424_v34  ;;  %241 = vst [vmem:[#allocation2 + $0x30] sm:$0x33] %v234_v35  ;;  %v277_v38 = vrot.slane %v272_v36, 4  ;;  %v278_v39 = vrot.slane %v845_v37, 4 }
  0x86   :  { %v280_v40 = vsel %vm86_vm3, %v277_v38, %v278_v39 }
  0x87   :  { %v282_v41 = vsel %vm281_vm6, %v272_v36, %v280_v40  ;;  %v319_v42 = vpop.permute.xlu0 %318  ;;  %v852_v43 = vpop.permute.xlu1 %320 }
  0x88   :  { %289 = vst [vmem:[#allocation2 + $0x30] sm:$0xcc] %v282_v41  ;;  %v324_v44 = vrot.slane %v319_v42, 4  ;;  %v325_v45 = vrot.slane %v852_v43, 4 }
  0x8a   :  { %v327_v46 = vsel %vm86_vm3, %v324_v44, %v325_v45 }
  0x8b   :  { %v329_v47 = vsel %vm328_vm7, %v319_v42, %v327_v46  ;;  %v367_v48 = vpop.permute.xlu0 %366  ;;  %v859_v49 = vpop.permute.xlu1 %368  ;;  %v447_v50 = vld [vmem:[#allocation2 + $0x60] sm:$0x33] }
  0x8c   :  { %336 = vst [vmem:[#allocation2 + $0x48] sm:$0x33] %v329_v47  ;;  %v372_v51 = vrot.slane %v367_v48, 4  ;;  %v373_v52 = vrot.slane %v859_v49, 4  ;;  %v707_v53 = vcombine.high %v447_v50, %v447_v50  ;;  %v706_v54 = vcombine.low %v447_v50, %v447_v50 }
  0x8e   :  { %v375_v55 = vsel %vm86_vm3, %v372_v51, %v373_v52  ;;  %712 = vmatprep.subr.msk.bf16.mxu0 %vm46_vm0, %v707_v53  ;;  %v536_v56 = vsel %vm46_vm0, %v706_v54, 0  ;;  %v434_v51 = vld [vmem:[%s989_s1] sm:$0xf] }
  0x8f   :  { %v377_v57 = vsel %vm376_vm8, %v367_v48, %v375_v55  ;;  %564 = vmatpush1.bf16.msra.mxu0 %v536_v56  ;;  %v868_v58 = vpop.permute.xlu1 %79  ;;  %v78_v59 = vpop.permute.xlu0 %77 }
  0x90   :  { %384 = vst [vmem:[#allocation2 + $0x48] sm:$0xcc] %v377_v57  ;;  %v84_v60 = vrot.slane %v868_v58, 4  ;;  %v83_v61 = vrot.slane %v78_v59, 4 }
  0x92   :  { %v87_v62 = vsel %vm86_vm3, %v83_v61, %v84_v60 }
  0x93   :  { %v89_v63 = vsel %vm88_vm9, %v78_v59, %v87_v62  ;;  %v875_v0 = vpop.permute.xlu1 %130  ;;  %v129_v1 = vpop.permute.xlu0 %128 }
  0x94   :  { %96 = vst [vmem:[#allocation2] sm:$0xcc] %v89_v63  ;;  %v135_v2 = vrot.slane %v875_v0, 4  ;;  %v134_v3 = vrot.slane %v129_v1, 4 }
  0x96   :  { %v137_v4 = vsel %vm86_vm3, %v134_v3, %v135_v2 }
  0x97   :  { %v139_v5 = vsel %vm138_vm10, %v129_v1, %v137_v4  ;;  %v882_v6 = vpop.permute.xlu1 %178  ;;  %v177_v7 = vpop.permute.xlu0 %176  ;;  %v737_v8 = vld [vmem:[#allocation2 + $0x34] ss:$24 sps:$4 sm:$0xff]   ;;  %v739_v9 = vld [vmem:[#allocation2 + $0x30] ss:$24 sps:$4 sm:$0xff]  }
  0x98   :  { %146 = vst [vmem:[#allocation2 + $0x18] sm:$0x33] %v139_v5  ;;  %v183_v10 = vrot.slane %v882_v6, 4  ;;  %v182_v11 = vrot.slane %v177_v7, 4  ;;  %565 = vmatprep.subr.bf16.mxu0 %v737_v8 }
  0x99   :  { %566 = vmatpush1.bf16.msra.mxu0 %v739_v9 }
  0x9a   :  { %v185_v12 = vsel %vm86_vm3, %v182_v11, %v183_v10 }
  0x9b   :  { %v187_v14 = vsel %vm186_vm11, %v177_v7, %v185_v12  ;;  %v228_v16 = vpop.permute.xlu1 %227  ;;  %v418_v17 = vpop.permute.xlu0 %417  ;;  %v435_v41 = vld [vmem:[#allocation2] sm:$0xff] }
  0x9c   :  { %194 = vst [vmem:[#allocation2 + $0x18] sm:$0xcc] %v187_v14  ;;  %v231_v18 = vrot.slane %v228_v16, 4  ;;  %v421_v19 = vrot.slane %v418_v17, 4 }
  0x9e   :  { %v235_v20 = vsel %vm86_vm3, %v230_v31, %v231_v18  ;;  %v237_v21 = vsel %vm233_vm5, %v228_v16, %v231_v18  ;;  %v425_v22 = vsel %vm86_vm3, %v420_v30, %v421_v19  ;;  %v427_v23 = vsel %vm423_vm4, %v418_v17, %v421_v19 }
  0x9f   :  { %v236_v24 = vsel %vm233_vm5, %v833_v27, %v235_v20  ;;  %243 = vst.msk [vmem:[#allocation2 + $0x40] sm:$0x33] %vm803_vm2, %v237_v21  ;;  %v426_v25 = vsel %vm423_vm4, %v831_v26, %v425_v22  ;;  %433 = vst.msk [vmem:[#allocation2 + $0x70] sm:$0x33] %vm803_vm2, %v427_v23  ;;  %v323_v28 = vpop.permute.xlu1 %322  ;;  %v276_v29 = vpop.permute.xlu0 %275 }
  0xa0   :  { %242 = vst [vmem:[#allocation2 + $0x38] sm:$0x33] %v236_v24  ;;  %432 = vst [vmem:[#allocation2 + $0x68] sm:$0x33] %v426_v25  ;;  %v326_v31 = vrot.slane %v323_v28, 4  ;;  %v279_v27 = vrot.slane %v276_v29, 4 }
  0xa2   :  { %v330_v32 = vsel %vm86_vm3, %v325_v45, %v326_v31  ;;  %v332_v26 = vsel %vm328_vm7, %v323_v28, %v326_v31  ;;  %v283_v33 = vsel %vm86_vm3, %v278_v39, %v279_v27  ;;  %v285_v34 = vsel %vm281_vm6, %v276_v29, %v279_v27 }
  0xa3   :  { %v331_v35 = vsel %vm328_vm7, %v852_v43, %v330_v32  ;;  %338 = vst.msk [vmem:[#allocation2 + $0x58] sm:$0x33] %vm803_vm2, %v332_v26  ;;  %v284_v36 = vsel %vm281_vm6, %v845_v37, %v283_v33  ;;  %v82_v38 = vpop.permute.xlu1 %81  ;;  %v371_v40 = vpop.permute.xlu0 %370  ;;  %v438_v42 = vld [vmem:[#allocation2 + $0x18] sm:$0xff] }
  0xa4   :  { %291 = vst.msk [vmem:[#allocation2 + $0x40] sm:$0xcc] %vm906_vm14, %v285_v34  ;;  %v740_v44 = vld [vmem:[#allocation2 + $0x4] ss:$24 sps:$4 sm:$0xff]   ;;  %337 = vst [vmem:[#allocation2 + $0x50] sm:$0x33] %v331_v35  ;;  %v694_v46 = vcombine.low %v435_v41, %v438_v42 }
  0xa5   :  { %290 = vst [vmem:[#allocation2 + $0x38] sm:$0xcc] %v284_v36  ;;  %v85_v39 = vrot.slane %v82_v38, 4  ;;  %v374_v45 = vrot.slane %v371_v40, 4  ;;  %567 = vmatprep.subr.bf16.mxu0 %v740_v44 }
  0xa6   :  { %568 = vmatpush1.bf16.msra.mxu0 %v694_v46  ;;  %v449_v50 = vld [vmem:[#allocation2 + $0x70] sm:$0x33] }
  0xa7   :  { %v90_v43 = vsel %vm86_vm3, %v84_v60, %v85_v39  ;;  %v92_v37 = vsel %vm88_vm9, %v82_v38, %v85_v39  ;;  %v378_v47 = vsel %vm86_vm3, %v373_v52, %v374_v45  ;;  %v380_v48 = vsel %vm376_vm8, %v371_v40, %v374_v45  ;;  %v181_v52 = vpop.permute.xlu1 %180  ;;  %v133_v55 = vpop.permute.xlu0 %132  ;;  %v448_v57 = vld [vmem:[#allocation2 + $0x68] sm:$0x33] }
  0xa8   :  { %v91_v53 = vsel %vm88_vm9, %v868_v58, %v90_v43  ;;  %101 = vst.msk [vmem:[#allocation2 + $0x10] sm:$0xcc] %vm906_vm14, %v92_v37  ;;  %v379_v54 = vsel %vm376_vm8, %v859_v49, %v378_v47  ;;  %386 = vst.msk [vmem:[#allocation2 + $0x58] sm:$0xcc] %vm906_vm14, %v380_v48  ;;  %v711_v56 = vcombine.high %v449_v50, %v449_v50  ;;  %v184_v60 = vrot.slane %v181_v52, 4 }
  0xa9   :  { %v710_v59 = vcombine.low %v449_v50, %v449_v50  ;;  %97 = vst [vmem:[#allocation2 + $0x8] sm:$0xcc] %v91_v53  ;;  %385 = vst [vmem:[#allocation2 + $0x50] sm:$0xcc] %v379_v54  ;;  %v136_v61 = vrot.slane %v133_v55, 4  ;;  %v709_v62 = vcombine.high %v448_v57, %v448_v57  ;;  %v708_v58 = vcombine.low %v448_v57, %v448_v57 }
  0xaa   :  { %716 = vmatprep.subr.msk.bf16.mxu0 %vm46_vm0, %v711_v56  ;;  %713 = vmatmul.mubr.msk.bf16.vlgmr.msra.gmra.mxu0 %vm531_vm15, %v434_v51  ;;  %v188_v63 = vsel %vm86_vm3, %v183_v10, %v184_v60  ;;  %v190_v1 = vsel %vm186_vm11, %v181_v52, %v184_v60 }
  0xab   :  { %v548_v49 = vsel %vm46_vm0, %v710_v59, 0  ;;  %v140_v3 = vsel %vm86_vm3, %v135_v2, %v136_v61  ;;  %v142_v4 = vsel %vm138_vm10, %v133_v55, %v136_v61  ;;  %714 = vmatprep.subr.msk.bf16.mxu1 %vm46_vm0, %v709_v62  ;;  %v189_v5 = vsel %vm186_vm11, %v882_v6, %v188_v63  ;;  %196 = vst.msk [vmem:[#allocation2 + $0x28] sm:$0xcc] %vm906_vm14, %v190_v1 }
  0xac   :  { %v141_v7 = vsel %vm138_vm10, %v875_v0, %v140_v3  ;;  %148 = vst.msk [vmem:[#allocation2 + $0x28] sm:$0x33] %vm803_vm2, %v142_v4  ;;  %v542_v8 = vsel %vm46_vm0, %v708_v58, 0  ;;  %646 = vmatpush1.bf16.msra.mxu0 %v548_v49  ;;  %667 = vmatprep.mubr.bf16.mxu0 %v767_v15  ;;  %195 = vst [vmem:[#allocation2 + $0x20] sm:$0xcc] %v189_v5  ;;  %vm681_vm0 = vcmask 64512  }
  0xad   :  { %147 = vst [vmem:[#allocation2 + $0x20] sm:$0x33] %v141_v7  ;;  %605 = vmatpush1.bf16.msra.mxu1 %v542_v8 }
  0xaf   :  { %v746_v2 = vld [vmem:[#allocation2 + $0x40] ss:$24 sps:$4 sm:$0xff]   ;;  %v748_v9 = vld [vmem:[#allocation2 + $0x44] ss:$24 sps:$4 sm:$0xff]  }
  0xb0   :  { %v749_v6 = vld [vmem:[#allocation2 + $0x3c] ss:$24 sps:$4 sm:$0xff]   ;;  %v751_v10 = vld [vmem:[#allocation2 + $0x38] ss:$24 sps:$4 sm:$0xff]   ;;  %647 = vmatprep.subr.bf16.mxu0 %v748_v9 }
  0xb1   :  { %606 = vmatprep.subr.bf16.mxu1 %v749_v6  ;;  %648 = vmatpush1.bf16.msra.mxu0 %v746_v2 }
  0xb2   :  { %607 = vmatpush1.bf16.msra.mxu1 %v751_v10 }
  0xb3   :  { %v752_v0 = vld [vmem:[#allocation2 + $0x10] ss:$24 sps:$4 sm:$0xff]   ;;  %v754_v11 = vld [vmem:[#allocation2 + $0x14] ss:$24 sps:$4 sm:$0xff]  }
  0xb4   :  { %v755_v13 = vld [vmem:[#allocation2 + $0xc] ss:$24 sps:$4 sm:$0xff]   ;;  %v757_v12 = vld [vmem:[#allocation2 + $0x8] ss:$24 sps:$4 sm:$0xff]   ;;  %649 = vmatprep.subr.bf16.mxu0 %v754_v11  ;;  %v454_v15 = vpop.permute.xlu0 %453 }
  0xb5   :  { %608 = vmatprep.subr.bf16.mxu1 %v755_v13  ;;  %650 = vmatpush1.bf16.msra.mxu0 %v752_v0 }
  0xb6   :  { %609 = vmatpush1.bf16.msra.mxu1 %v757_v12 }
  0xb8   :  { %717 = vmatmul.mubr.msk.bf16.vlgmr.msra.gmra.mxu0 %vm531_vm15, %v434_v51 }
  0xb9   :  { %715 = vmatmul.mubr.msk.bf16.vlgmr.msra.gmra.mxu1 %vm531_vm15, %v434_v51 }
 0x16a   :  { %v587_v14 = vpop.f32.mrf.mxu0 }
 0x16b   :  { %v588_v16 = vadd.f32 %v587_v14, %v454_v15 }
 0x16c   :  { %v589_v17 = vpop.f32.mrf.mxu0 }
 0x16d   :  { %v590_v18 = vadd.f32 %v589_v17, %v454_v15  ;;  %676 = vst [vmem:[%s990_s3] sm:$0xff] %v588_v16 }
 0x16e   :  { %v591_v19 = vpop.f32.mrf.mxu0 }
 0x16f   :  { %677 = vst [vmem:[%s990_s3 + $0x8] sm:$0xff] %v590_v18 }
 0x170   :  { %v592_v20 = vpop.f32.mrf.mxu0 }
 0x178   :  { %v669_v21 = vpop.f32.mrf.mxu0 }
 0x179   :  { %v670_v22 = vadd.f32 %v669_v21, %v454_v15  ;;  %v628_v23 = vpop.f32.mrf.mxu1 }
 0x17a   :  { %v629_v24 = vadd.f32 %v628_v23, %v454_v15  ;;  %v671_v25 = vpop.f32.mrf.mxu0 }
 0x17b   :  { %680 = vst [vmem:[%s990_s3 + $0x20] sm:$0xff] %v670_v22  ;;  %v672_v28 = vadd.f32 %v671_v25, %v454_v15  ;;  %v630_v29 = vpop.f32.mrf.mxu1 }
 0x17c   :  { %678 = vst [vmem:[%s990_s3 + $0x10] sm:$0xff] %v629_v24  ;;  %v631_v31 = vadd.f32 %v630_v29, %v454_v15  ;;  %v673_v30 = vpop.f32.mrf.mxu0 }
 0x17d   :  { %682 = vst.msk [vmem:[%s990_s3 + $0x28] sm:$0xff] %vm681_vm0, %v672_v28  ;;  %v632_v27 = vpop.f32.mrf.mxu1 }
 0x17e   :  { %679 = vst [vmem:[%s990_s3 + $0x18] sm:$0xff] %v631_v31  ;;  %v674_v32 = vpop.f32.mrf.mxu0 }
 0x17f   :  { %v633_v26 = vpop.f32.mrf.mxu1 }

</bundles_post_ra>
